<compile_context>
chip_gen: v5e
topology: v5e:2x2
jax: 0.10.0
libtpu: 0.0.40
codegen_flags: <defaults>
</compile_context>

<pallas_src>
import enum
import functools

import jax
import jax.numpy as jnp
from jax.experimental import pallas as pl
from jax.experimental.pallas import tpu as pltpu


LANE = 128  # lane (last-dim) width of a TPU vreg


# ----------------------------- model modes ---------------------------------
class ModelMode(enum.Enum):
    UPDATE_TASK_NN = "task"
    UPDATE_SCORE_NN = "score"


# ----------------------------- helpers --------------------------------------
def _round_up(n: int, m: int) -> int:
    return ((n + m - 1) // m) * m


def _pad2(a, rows, cols):
    return jnp.pad(a, ((0, rows - a.shape[0]), (0, cols - a.shape[1])))


def _vmem_spec():
    return pl.BlockSpec(memory_space=pltpu.MemorySpace.VMEM)


def _mlp_logits(x_ref, w1_ref, b1_ref, w2_ref, b2_ref):
    """Shared 2-layer MLP body: bf16 MXU matmuls, f32 accumulation."""
    x = x_ref[...].astype(jnp.bfloat16)
    h = jnp.dot(x, w1_ref[...], preferred_element_type=jnp.float32) + b1_ref[...]
    h = jnp.maximum(h, 0.0)
    logits = (
        jnp.dot(h.astype(jnp.bfloat16), w2_ref[...], preferred_element_type=jnp.float32)
        + b2_ref[...]
    )
    return x, logits


# ----------------------------- fused Pallas kernels -------------------------
def _tasknn_fused_kernel(num_labels, x_ref, w1_ref, b1_ref, w2_ref, b2_ref,
                         y_true_ref, y_pred_ref, loss_ref):
    """task_net forward + BCE-with-logits loss, fused in one kernel."""
    _, logits = _mlp_logits(x_ref, w1_ref, b1_ref, w2_ref, b2_ref)
    y_pred_ref[...] = jax.nn.sigmoid(logits).astype(y_pred_ref.dtype)

    # Stable BCE from logits: max(z,0) - z*t + log(1 + exp(-|z|))
    t = y_true_ref[...].astype(jnp.float32)
    z = logits
    per_elem = jnp.maximum(z, 0.0) - z * t + jnp.log(1.0 + jnp.exp(-jnp.abs(z)))

    B, Lp = per_elem.shape
    valid = jax.lax.broadcasted_iota(jnp.int32, (B, Lp), 1) < num_labels
    loss = jnp.sum(jnp.where(valid, per_elem, 0.0)) / jnp.float32(B * num_labels)
    loss_ref[...] = jnp.reshape(loss, (1, 1))


def _scorenn_fused_kernel(num_labels, x_ref, w1_ref, b1_ref, w2_ref, b2_ref,
                          we_ref, y_true_ref, y_hat_ref, loss_ref):
    """task_net forward + energy score_net hinge loss, fused in one kernel."""
    x_bf16, logits = _mlp_logits(x_ref, w1_ref, b1_ref, w2_ref, b2_ref)
    y_hat = jax.nn.sigmoid(logits)
    y_hat_ref[...] = y_hat.astype(y_hat_ref.dtype)

    B, Lp = logits.shape
    valid = jax.lax.broadcasted_iota(jnp.int32, (B, Lp), 1) < num_labels
    y_hat_m = jnp.where(valid, y_hat, 0.0)        # zero out padded label columns
    y_true = y_true_ref[...].astype(jnp.float32)  # already zero in padded columns

    # energy: E(x, y) = sum_l (x @ We)_l * y_l   (one MXU matmul + VPU reduce)
    local = jnp.dot(x_bf16, we_ref[...], preferred_element_type=jnp.float32)
    e_true = jnp.sum(local * y_true, axis=-1, keepdims=True)
    e_hat = jnp.sum(local * y_hat_m, axis=-1, keepdims=True)
    hinge = jnp.maximum(1.0 + e_hat - e_true, 0.0)  # margin ranking loss
    loss_ref[...] = jnp.reshape(jnp.mean(hinge), (1, 1))


# ----------------------------- pallas_call wrappers --------------------------
@functools.partial(jax.jit, static_argnames=("num_labels",))
def tasknn_forward(x, w1, b1, w2, b2, y_true, *, num_labels):
    B = x.shape[0]
    Lp = w2.shape[1]
    y_pred, loss = pl.pallas_call(
        functools.partial(_tasknn_fused_kernel, num_labels),
        out_shape=(
            jax.ShapeDtypeStruct((B, Lp), jnp.float32),
            jax.ShapeDtypeStruct((1, 1), jnp.float32),
        ),
        in_specs=[_vmem_spec()] * 6,
        out_specs=(_vmem_spec(), _vmem_spec()),
    )(x, w1, b1, w2, b2, y_true)
    return y_pred, loss[0, 0]


@functools.partial(jax.jit, static_argnames=("num_labels",))
def scorenn_forward(x, w1, b1, w2, b2, we, y_true, *, num_labels):
    B = x.shape[0]
    Lp = w2.shape[1]
    y_hat, loss = pl.pallas_call(
        functools.partial(_scorenn_fused_kernel, num_labels),
        out_shape=(
            jax.ShapeDtypeStruct((B, Lp), jnp.float32),
            jax.ShapeDtypeStruct((1, 1), jnp.float32),
        ),
        in_specs=[_vmem_spec()] * 7,
        out_specs=(_vmem_spec(), _vmem_spec()),
    )(x, w1, b1, w2, b2, we, y_true)
    return y_hat, loss[0, 0]


# ----------------------------- SEALBase (JAX) -------------------------------
class SEALBasePallas:
    """JAX/Pallas mirror of seal.wrappers.model.SEALBase with concrete nets.

    task_net + task_net_loss_fn (resp. score_net_loss_fn) are fused into a
    single Pallas kernel per forward mode; the original per-method structure
    is preserved at the wrapper level.
    """

    def __init__(self, num_features: int, hidden: int, num_labels: int, key):
        self.num_labels = num_labels
        self.Fp = _round_up(num_features, LANE)
        self.Hp = _round_up(hidden, LANE)
        self.Lp = _round_up(num_labels, LANE)

        k1, k2, k3 = jax.random.split(key, 3)
        s1 = 1.0 / jnp.sqrt(num_features)
        s2 = 1.0 / jnp.sqrt(hidden)
        w1 = jax.random.normal(k1, (num_features, hidden), jnp.float32) * s1
        w2 = jax.random.normal(k2, (hidden, num_labels), jnp.float32) * s2
        we = jax.random.normal(k3, (num_features, num_labels), jnp.float32) * s1

        # zero-padded to lane-dense shapes; weights stored bf16 (MXU operands),
        # biases kept f32 (added post-accumulation).
        self.w1 = _pad2(w1, self.Fp, self.Hp).astype(jnp.bfloat16)
        self.b1 = jnp.zeros((1, self.Hp), jnp.float32)
        self.w2 = _pad2(w2, self.Hp, self.Lp).astype(jnp.bfloat16)
        self.b2 = jnp.zeros((1, self.Lp), jnp.float32)
        self.we = _pad2(we, self.Fp, self.Lp).astype(jnp.bfloat16)

    # --- pieces corresponding to the PyTorch module methods -----------------
    def normalize(self, y):
        return y

    def unsqueeze_labels(self, labels):
        return labels[:, None, :]            # labels.unsqueeze(1)

    def squeeze_y(self, y):
        return jnp.squeeze(y, axis=1)

    def convert_to_one_hot(self, labels):
        # one-hot directly into the lane-padded width; padded columns are zero.
        return jax.nn.one_hot(labels, self.Lp, dtype=jnp.float32)

    def initialize_buffer(self, **kwargs):
        return {"task": "labeled"}

    def _pad_x(self, x):
        return _pad2(x, x.shape[0], self.Fp)

    # --- forward plumbing (mirrors the PyTorch control flow) ----------------
    def construct_args_for_forward(self, **kwargs):
        kwargs["buffer"] = self.initialize_buffer(**kwargs)
        return kwargs

    def forward(self, **kwargs):
        return self._forward(**self.construct_args_for_forward(**kwargs))

    def _forward(self, x, labels, mode, **kwargs):
        if mode == ModelMode.UPDATE_TASK_NN:
            return self.forward_on_tasknn(x, labels, **kwargs)
        elif mode == ModelMode.UPDATE_SCORE_NN:
            return self.forward_on_scorenn(x, labels, **kwargs)
        raise ValueError

    def forward_on_tasknn(self, x, labels, buffer, meta=None, **kwargs):
        results = {}
        if labels is not None and "labeled" in buffer.get("task"):
            labels = self.convert_to_one_hot(labels)
        # fused: task_net + task_net_loss_fn (BCE with logits) in one kernel
        y_pred_p, loss = tasknn_forward(
            self._pad_x(x), self.w1, self.b1, self.w2, self.b2, labels,
            num_labels=self.num_labels)
        y_pred = y_pred_p[:, : self.num_labels][:, None, :]      # unsqueeze(1)
        y_pred, loss = self.normalize(y_pred), self.normalize(loss)
        results["loss"] = loss
        results["y_pred"] = self.squeeze_y(y_pred)
        return results

    def forward_on_scorenn(self, x, labels, buffer, **kwargs):
        results = {}
        if labels is not None and "labeled" in buffer.get("task"):
            labels = self.convert_to_one_hot(labels)
        # fused: task_net (-> y_hat) + score_net hinge loss in one kernel
        # TODO(synk): upstream PyTorch code references undefined `y_pred` here
        # (a bug in the reference); only the score_net_loss_fn loss is returned.
        y_hat_p, loss = scorenn_forward(
            self._pad_x(x), self.w1, self.b1, self.w2, self.b2, self.we, labels,
            num_labels=self.num_labels)
        y_hat = y_hat_p[:, : self.num_labels][:, None, :]         # unsqueeze(1)
        results["y_hat"] = y_hat
        results["y_hat_extra"] = y_hat
        results["loss"] = loss
        return results


# ----------------------------- pure-JAX reference ---------------------------
def _ref_logits(x_p, w1, b1, w2, b2):
    h = jnp.dot(x_p.astype(jnp.bfloat16), w1, preferred_element_type=jnp.float32) + b1
    h = jnp.maximum(h, 0.0)
    return jnp.dot(h.astype(jnp.bfloat16), w2, preferred_element_type=jnp.float32) + b2


def _ref_task(model, x_p, y1h, L):
    logits = _ref_logits(x_p, model.w1, model.b1, model.w2, model.b2)
    y_pred = jax.nn.sigmoid(logits)[:, :L]
    z, t = logits[:, :L], y1h[:, :L]
    bce = jnp.mean(jnp.maximum(z, 0.0) - z * t + jnp.log(1.0 + jnp.exp(-jnp.abs(z))))
    return y_pred, bce


def _ref_score(model, x_p, y1h, L):
    logits = _ref_logits(x_p, model.w1, model.b1, model.w2, model.b2)
    y_hat = jax.nn.sigmoid(logits)[:, :L]
    local = jnp.dot(x_p.astype(jnp.bfloat16), model.we,
                    preferred_element_type=jnp.float32)[:, :L]
    e_true = jnp.sum(local * y1h[:, :L], axis=-1)
    e_hat = jnp.sum(local * y_hat, axis=-1)
    return y_hat, jnp.mean(jnp.maximum(1.0 + e_hat - e_true, 0.0))


# ----------------------------- demo / smoke test ----------------------------
if __name__ == "__main__":
    B, F, H, L = 8, 32, 32, 16

    key = jax.random.PRNGKey(0)
    kx, ky, kp = jax.random.split(key, 3)
    x = jax.random.normal(kx, (B, F), jnp.float32)
    labels = jax.random.randint(ky, (B,), 0, L)          # class indices

    model = SEALBasePallas(num_features=F, hidden=H, num_labels=L, key=kp)

    res_task = model.forward(x=x, labels=labels, mode=ModelMode.UPDATE_TASK_NN)
    res_score = model.forward(x=x, labels=labels, mode=ModelMode.UPDATE_SCORE_NN)

    jax.block_until_ready(res_task["loss"])
    jax.block_until_ready(res_task["y_pred"])
    jax.block_until_ready(res_score["loss"])
    jax.block_until_ready(res_score["y_hat"])

    assert res_task["y_pred"].shape == (B, L)
    assert res_score["y_hat"].shape == (B, 1, L)
    assert res_task["loss"].shape == () and res_score["loss"].shape == ()

    # numerical self-check against a pure-JAX reference (same bf16/f32 math)
    x_p = model._pad_x(x)
    y1h = model.convert_to_one_hot(labels)
    ref_pred, ref_bce = _ref_task(model, x_p, y1h, L)
    ref_hat, ref_hinge = _ref_score(model, x_p, y1h, L)
    assert jnp.allclose(res_task["y_pred"], ref_pred, rtol=1e-3, atol=1e-3)
    assert jnp.allclose(res_task["loss"], ref_bce, rtol=1e-3, atol=1e-3)
    assert jnp.allclose(res_score["y_hat"][:, 0, :], ref_hat, rtol=1e-3, atol=1e-3)
    assert jnp.allclose(res_score["loss"], ref_hinge, rtol=1e-3, atol=1e-3)

    print("KERNEL_OK")
</pallas_src>

<mosaic_0001>
module attributes {stable_mosaic.version = 11 : i64} {
  func.func @_tasknn_fused_kernel(%arg0: memref<8x128xf32, #tpu.memory_space<vmem>>, %arg1: memref<128x128xbf16, #tpu.memory_space<vmem>>, %arg2: memref<1x128xf32, #tpu.memory_space<vmem>>, %arg3: memref<128x128xbf16, #tpu.memory_space<vmem>>, %arg4: memref<1x128xf32, #tpu.memory_space<vmem>>, %arg5: memref<8x128xf32, #tpu.memory_space<vmem>>, %arg6: memref<8x128xf32, #tpu.memory_space<vmem>>, %arg7: memref<1x1xf32, #tpu.memory_space<vmem>>) attributes {dimension_semantics = [], scalar_prefetch = 0 : i64, scratch_operands = 0 : i64, tpu.core_type = #tpu.core_type<tc>} {
    %c0 = arith.constant 0 : index
    %c0_0 = arith.constant 0 : index
    %0 = vector.load %arg0[%c0, %c0_0] : memref<8x128xf32, #tpu.memory_space<vmem>>, vector<8x128xf32>
    %1 = arith.truncf %0 : vector<8x128xf32> to vector<8x128xbf16>
    %c0_1 = arith.constant 0 : index
    %c0_2 = arith.constant 0 : index
    %2 = vector.load %arg1[%c0_1, %c0_2] : memref<128x128xbf16, #tpu.memory_space<vmem>>, vector<128x128xbf16>
    %cst = arith.constant dense<0.000000e+00> : vector<8x128xf32>
    %3 = tpu.matmul %1, %2, %cst {dimension_numbers = #tpu.dot_dimension_numbers<[1], [0], [0], [1], [0, 0, 1, 1], [], []>} : vector<8x128xbf16>, vector<128x128xbf16>, vector<8x128xf32> -> vector<8x128xf32>
    %c0_3 = arith.constant 0 : index
    %c0_4 = arith.constant 0 : index
    %4 = vector.load %arg2[%c0_3, %c0_4] : memref<1x128xf32, #tpu.memory_space<vmem>>, vector<1x128xf32>
    %5 = vector.broadcast %4 : vector<1x128xf32> to vector<8x128xf32>
    %6 = arith.addf %3, %5 : vector<8x128xf32>
    %cst_5 = arith.constant 0.000000e+00 : f32
    %7 = vector.broadcast %cst_5 : f32 to vector<8x128xf32>
    %8 = arith.maximumf %6, %7 : vector<8x128xf32>
    %9 = arith.truncf %8 : vector<8x128xf32> to vector<8x128xbf16>
    %c0_6 = arith.constant 0 : index
    %c0_7 = arith.constant 0 : index
    %10 = vector.load %arg3[%c0_6, %c0_7] : memref<128x128xbf16, #tpu.memory_space<vmem>>, vector<128x128xbf16>
    %cst_8 = arith.constant dense<0.000000e+00> : vector<8x128xf32>
    %11 = tpu.matmul %9, %10, %cst_8 {dimension_numbers = #tpu.dot_dimension_numbers<[1], [0], [0], [1], [0, 0, 1, 1], [], []>} : vector<8x128xbf16>, vector<128x128xbf16>, vector<8x128xf32> -> vector<8x128xf32>
    %c0_9 = arith.constant 0 : index
    %c0_10 = arith.constant 0 : index
    %12 = vector.load %arg4[%c0_9, %c0_10] : memref<1x128xf32, #tpu.memory_space<vmem>>, vector<1x128xf32>
    %13 = vector.broadcast %12 : vector<1x128xf32> to vector<8x128xf32>
    %14 = arith.addf %11, %13 : vector<8x128xf32>
    %15 = arith.negf %14 : vector<8x128xf32>
    %16 = math.exp %15 : vector<8x128xf32>
    %cst_11 = arith.constant 1.000000e+00 : f32
    %17 = vector.broadcast %cst_11 : f32 to vector<8x128xf32>
    %18 = arith.addf %17, %16 : vector<8x128xf32>
    %19 = arith.divf %17, %18 : vector<8x128xf32>
    %c0_12 = arith.constant 0 : index
    %c0_13 = arith.constant 0 : index
    %20 = vector.load %arg6[%c0_12, %c0_13] : memref<8x128xf32, #tpu.memory_space<vmem>>, vector<8x128xf32>
    tpu.vector_store %arg6[%c0_12, %c0_13], %19 {strides = array<i32>} : memref<8x128xf32, #tpu.memory_space<vmem>>, vector<8x128xf32>,
    %c0_14 = arith.constant 0 : index
    %c0_15 = arith.constant 0 : index
    %21 = vector.load %arg5[%c0_14, %c0_15] : memref<8x128xf32, #tpu.memory_space<vmem>>, vector<8x128xf32>
    %cst_16 = arith.constant 0.000000e+00 : f32
    %22 = vector.broadcast %cst_16 : f32 to vector<8x128xf32>
    %23 = arith.maximumf %14, %22 : vector<8x128xf32>
    %24 = arith.mulf %14, %21 : vector<8x128xf32>
    %25 = arith.subf %23, %24 : vector<8x128xf32>
    %26 = math.absf %14 : vector<8x128xf32>
    %cst_17 = arith.constant 0.000000e+00 : f32
    %27 = vector.broadcast %cst_17 : f32 to vector<8x128xf32>
    %28 = arith.subf %27, %26 : vector<8x128xf32>
    %29 = math.exp %28 : vector<8x128xf32>
    %cst_18 = arith.constant 1.000000e+00 : f32
    %30 = vector.broadcast %cst_18 : f32 to vector<8x128xf32>
    %31 = arith.addf %30, %29 : vector<8x128xf32>
    %32 = math.log %31 : vector<8x128xf32>
    %33 = arith.addf %25, %32 : vector<8x128xf32>
    %34 = tpu.iota {dimensions = array<i32: 1>} : vector<8x128xi32>
    %c16_i32 = arith.constant 16 : i32
    %35 = vector.broadcast %c16_i32 : i32 to vector<8x128xi32>
    %36 = arith.cmpi slt, %34, %35 : vector<8x128xi32>
    %cst_19 = arith.constant 0.000000e+00 : f32
    %37 = vector.broadcast %cst_19 : f32 to vector<8x128xf32>
    %38 = arith.select %36, %33, %37 : vector<8x128xi1>, vector<8x128xf32>
    %39 = vector.shape_cast %38 : vector<8x128xf32> to vector<1x8x128xf32>
    %cst_20 = arith.constant dense<0.000000e+00> : vector<1xf32>
    %40 = vector.multi_reduction <add>, %39, %cst_20 [1, 2] : vector<1x8x128xf32> to vector<1xf32>
    %41 = vector.shape_cast %40 : vector<1xf32> to vector<1x1x1xf32>
    %42 = vector.extract %41[0, 0, 0] : f32 from vector<1x1x1xf32>
    %cst_21 = arith.constant 1.280000e+02 : f32
    %43 = arith.divf %42, %cst_21 : f32
    %44 = vector.broadcast %43 : f32 to vector<1x1xf32>
    %c0_22 = arith.constant 0 : index
    %c0_23 = arith.constant 0 : index
    %45 = vector.load %arg7[%c0_22, %c0_23] : memref<1x1xf32, #tpu.memory_space<vmem>>, vector<1x1xf32>
    tpu.vector_store %arg7[%c0_22, %c0_23], %44 {strides = array<i32>} : memref<1x1xf32, #tpu.memory_space<vmem>>, vector<1x1xf32>,
    return
  }
}

</mosaic_0001>

<bundles_post_ra>
// kernel: tasknn_forward.1
= control target key start
LH: loop header
LB: loop body
LE: loop exit
PB: predicated region body
PF: predicated region fallthrough
CT: control target
= control target key end

     0   :  { %13 = vsyncpa [#allocation3], 0  ;;  %s677_s0 = inlined_call_operand.hbm [shape: f32[8,128], index: 0, kind: input, shape index: {}]   ;;  %s678_s1 = inlined_call_operand.hbm [shape: bf16[128,128], index: 1, kind: input, shape index: {}]   ;;  %s679_s2 = inlined_call_operand.vmem [shape: f32[1,128], index: 2, kind: input, shape index: {}]   ;;  %s680_s3 = inlined_call_operand.hbm [shape: bf16[128,128], index: 3, kind: input, shape index: {}]   ;;  %s681_s4 = inlined_call_operand.vmem [shape: f32[1,128], index: 4, kind: input, shape index: {}]   ;;  %s682_s5 = inlined_call_operand.hbm [shape: f32[8,128], index: 5, kind: input, shape index: {}]   ;;  %s683_s6 = inlined_call_operand.hbm [shape: f32[8,128], index: 6, kind: output, shape index: {0}]   ;;  %s684_s7 = inlined_call_operand.hbm [shape: f32[1,1], index: 7, kind: output, shape index: {1}]  }
   0x1   :  { %14 = vsyncpa [#allocation6], 0 }
   0x2   :  { %15 = vsyncpa [#allocation9], 0 }
   0x3   :  { %16 = vsyncpa [#allocation4], 0  ;;  %s33_s26 = sshll.u32 %s678_s1, 4  ;;  %s34_s26 = int_to_ptr.hbm [resolvable:$true] %s33_s26 }
   0x4   :  { %17 = vsyncpa [#allocation12], 0  ;;  %s604_s27 = smov [#allocation5]   ;;  %s23_s8 = sshll.u32 %s677_s0, 4  ;;  %s24_s8 = int_to_ptr.hbm [resolvable:$true] %s23_s8 }
   0x5   :  { %s35_s28 = sshll.u32 %s604_s27, 4  ;;  %s605_s9 = smov 64   ;;  %s36_s28 = int_to_ptr.vmem [resolvable:$true] %s35_s28 }
   0x6   :  { %s606_s10 = smov 4   ;;  %s607_s11 = smov [#allocation2]  }
   0x7   :  { %41 = dma.hbm_to_vmem [thread:$0]  %s34_s26, 1024, %s36_s28, [#allocation6], %s605_s9, %s605_s9, %s606_s10  }
   0x8   :  { %s25_s12 = sshll.u32 %s607_s11, 4  ;;  %s48_s15 = sshll.u32 %s680_s3, 4  ;;  %s26_s12 = int_to_ptr.vmem [resolvable:$true] %s25_s12  ;;  %s49_s15 = int_to_ptr.hbm [resolvable:$true] %s48_s15 }
   0x9   :  { %28 = dma.hbm_to_vmem [thread:$0]  %s24_s8, 128, %s26_s12, [#allocation3]  }
   0xa   :  { %s64_s17 = sshll.u32 %s682_s5, 4  ;;  %s608_s18 = smov [#allocation7]   ;;  %s65_s17 = int_to_ptr.hbm [resolvable:$true] %s64_s17 }
   0xb   :  { %s50_s19 = sshll.u32 %s608_s18, 4  ;;  %s609_s0 = smov [#allocation8]   ;;  %s51_s19 = int_to_ptr.vmem [resolvable:$true] %s50_s19 }
   0xc   :  { %56 = dma.hbm_to_vmem [thread:$0]  %s49_s15, 1024, %s51_s19, [#allocation6], %s605_s9, %s605_s9, %s606_s10  }
   0xd   :  { %s66_s20 = sshll.u32 %s609_s0, 4  ;;  %s67_s20 = int_to_ptr.vmem [resolvable:$true] %s66_s20 }
   0xe   :  { %69 = dma.hbm_to_vmem [thread:$0]  %s65_s17, 128, %s67_s20, [#allocation9]  }
   0xf   :  { %594 = dma.done.wait [#allocation3], 128  }
  0x10   :  { %595 = vsyncadd [#allocation3], 4294967168 }
  0x11   :  { %596 = dma.done.wait [#allocation6], 2048  }
  0x12   :  { %597 = vsyncadd [#allocation6], 4294965248 }
  0x13   :  { %598 = dma.done.wait [#allocation9], 128  }
  0x14   :  { %599 = vsyncadd [#allocation9], 4294967168  ;;  %v416_v0 = vld [vmem:[#allocation5 + $0x38] sm:$0xff]  ;;  %v415_v1 = vld [vmem:[#allocation5 + $0x30] sm:$0xff]  ;;  %v284_v37 = vlaneseq  ;;  %s316_s25 = sshll.u32 %s683_s6, 4  ;;  %v611_v56 = vmov 128.0   ;;  %s317_s25 = int_to_ptr.hbm [resolvable:$true] %s316_s25 }
  0x15   :  { %156 = vmatpush.bf16.msra.mxu0 %v416_v0  ;;  %v424_v2 = vld [vmem:[#allocation7 + $0x38] sm:$0xff]  ;;  %v423_v3 = vld [vmem:[#allocation7 + $0x30] sm:$0xff]  ;;  %v414_v4 = vld [vmem:[#allocation5 + $0x28] sm:$0xff]  ;;  %s612_s6 = smov [#allocation11]   ;;  %s327_s30 = sshll.u32 %s684_s7, 4  ;;  %vm307_vm6 = vcmask 0   ;;  %s328_s30 = int_to_ptr.hbm [resolvable:$true] %s327_s30 }
  0x16   :  { %239 = vmatpush.bf16.msra.mxu1 %v424_v2  ;;  %v422_v5 = vld [vmem:[#allocation7 + $0x28] sm:$0xff]  ;;  %v413_v6 = vld [vmem:[#allocation5 + $0x20] sm:$0xff]  ;;  %v412_v8 = vld [vmem:[#allocation5 + $0x18] sm:$0xff]  ;;  %v285_v42 = vand.u32 127, %v284_v37  ;;  %s325_s26 = sshll.u32 %s612_s6, 4  ;;  %s326_s26 = int_to_ptr.vmem [resolvable:$true] %s325_s26 }
  0x17   :  { %v421_v7 = vld [vmem:[#allocation7 + $0x20] sm:$0xff]  ;;  %v420_v9 = vld [vmem:[#allocation7 + $0x18] sm:$0xff]  ;;  %v411_v10 = vld [vmem:[#allocation5 + $0x10] sm:$0xff] }
  0x18   :  { %v419_v11 = vld [vmem:[#allocation7 + $0x10] sm:$0xff]  ;;  %v410_v12 = vld [vmem:[#allocation5 + $0x8] sm:$0xff]  ;;  %v409_v13 = vld [vmem:[#allocation5] sm:$0xff]  ;;  %vm286_vm1 = vcmp.lt.s32.totalorder %v285_v42, 16 }
  0x19   :  { %157 = vmatpush.bf16.msra.mxu0 %v415_v1  ;;  %v86_v14 = vld [vmem:[#allocation2] sm:$0xff]  ;;  %v418_v16 = vld [vmem:[#allocation7 + $0x8] sm:$0xff]  ;;  %v417_v17 = vld [vmem:[#allocation7] sm:$0xff] }
  0x1a   :  { %240 = vmatpush.bf16.msra.mxu1 %v423_v3  ;;  %v87_v15 = vpack.c.bf16 %v86_v14, %v86_v14  ;;  %v438_v18 = vld [vmem:[%s679_s2] ss:$0 sm:$0xff]  ;;  %v272_v36 = vld [vmem:[#allocation8] sm:$0xff]  ;;  %s610_s2 = smov [#allocation10]  }
  0x1b   :  { %v439_v24 = vld [vmem:[%s681_s4] ss:$0 sm:$0xff]  ;;  %s314_s4 = sshll.u32 %s610_s2, 4  ;;  %s315_s4 = int_to_ptr.vmem [resolvable:$true] %s314_s4 }
  0x1d   :  { %158 = vmatpush.bf16.msra.mxu0 %v414_v4 }
  0x1e   :  { %241 = vmatpush.bf16.msra.mxu1 %v422_v5 }
  0x21   :  { %159 = vmatpush.bf16.msra.mxu0 %v413_v6 }
  0x22   :  { %242 = vmatpush.bf16.msra.mxu1 %v421_v7 }
  0x25   :  { %160 = vmatpush.bf16.msra.mxu0 %v412_v8 }
  0x26   :  { %243 = vmatpush.bf16.msra.mxu1 %v420_v9 }
  0x29   :  { %161 = vmatpush.bf16.msra.mxu0 %v411_v10 }
  0x2a   :  { %244 = vmatpush.bf16.msra.mxu1 %v419_v11 }
  0x2d   :  { %162 = vmatpush.bf16.msra.mxu0 %v410_v12 }
  0x2e   :  { %245 = vmatpush.bf16.msra.mxu1 %v418_v16 }
  0x31   :  { %163 = vmatpush.bf16.msra.mxu0 %v409_v13 }
  0x32   :  { %246 = vmatpush.bf16.msra.mxu1 %v417_v17 }
  0x34   :  { %164 = vmatmul.bf16.vlgmr.msra.gmra.mxu0 %v87_v15 }
  0xb1   :  { %v165_v19 = vpop.f32.mrf.mxu0 }
  0xb2   :  { %v166_v20 = vadd.f32 %v438_v18, %v165_v19 }
  0xb4   :  { %v169_v21 = vmax.f32 %v166_v20, 0.0 }
  0xb6   :  { %v170_v22 = vpack.c.bf16 %v169_v21, %v169_v21 }
  0xb8   :  { %247 = vmatmul.bf16.vlgmr.msra.gmra.mxu1 %v170_v22 }
  0xb9   :  { %v167_v23 = vpop.f32.mrf.mxu0 }
 0x135   :  { %v248_v25 = vpop.f32.mrf.mxu1 }
 0x136   :  { %v249_v26 = vadd.f32 %v439_v24, %v248_v25 }
 0x138   :  { %v408_v27 = vmul.f32 -1.442695, %v249_v26  ;;  %v276_v28 = vand.u32 2147483647, %v249_v26  ;;  %v273_v39 = vmax.f32 %v249_v26, 0.0  ;;  %v274_v40 = vmul.f32 %v272_v36, %v249_v26 }
 0x13a   :  { %440 = vpow2.f32 %v408_v27  ;;  %v277_v29 = vsub.f32 0.0, %v276_v28  ;;  %v275_v45 = vsub.f32 %v273_v39, %v274_v40 }
 0x13c   :  { %v278_v30 = vmul.f32 1.442695, %v277_v29 }
 0x13d   :  { %v250_v31 = vpop.f32.mrf.mxu1 }
 0x13e   :  { %442 = vpow2.f32 %v278_v30 }
 0x140   :  { %v441_v32 = vpop.eup %440 }
 0x141   :  { %v255_v33 = vadd.f32 1.0, %v441_v32 }
 0x143   :  { %444 = vrcp.f32 %v255_v33  ;;  %v267_v46 = vand.u32 2147483648, %v255_v33  ;;  %v265_v49 = vand.u32 2147483647, %v255_v33  ;;  %vm261_vm2 = vweird.f32 %v255_v33 }
 0x144   :  { %v443_v34 = vpop.eup %442 }
 0x145   :  { %v280_v35 = vadd.f32 1.0, %v443_v34  ;;  %v268_v52 = vor.u32 1.1754944e-38, %v267_v46  ;;  %vm266_vm4 = vcmp.eq.f32.partialorder %v265_v49, 8.507059e+37 }
 0x147   :  { %446 = vlog2.f32 %v280_v35 }
 0x148   :  { %448 = vrcp.f32 %v611_v56 }
 0x149   :  { %v445_v38 = vpop.eup %444 }
 0x14a   :  { %v257_v41 = vmul.f32 %v445_v38, %v255_v33  ;;  %vm262_vm0 = vweird.f32 %v445_v38 }
 0x14b   :  { %vm263_vm3 = vmor %vm261_vm2, %vm262_vm0 }
 0x14c   :  { %v258_v43 = vsub.f32 1.0, %v257_v41 }
 0x14d   :  { %v447_v44 = vpop.eup %446 }
 0x14e   :  { %v282_v47 = vmul.f32 0.6931472, %v447_v44  ;;  %v259_v48 = vmul.f32 %v445_v38, %v258_v43  ;;  %v449_v57 = vpop.eup %448 }
 0x14f   :  { %v298_v58 = vmul.f32 128.0, %v449_v57  ;;  %vm302_vm5 = vweird.f32 %v449_v57 }
 0x150   :  { %v283_v50 = vadd.f32 %v282_v47, %v275_v45  ;;  %v260_v51 = vadd.f32 %v445_v38, %v259_v48 }
 0x151   :  { %v299_v59 = vsub.f32 1.0, %v298_v58 }
 0x152   :  { %v287_v53 = vsel %vm286_vm1, %v283_v50, 0.0  ;;  %v264_v54 = vsel %vm263_vm3, %v445_v38, %v260_v51 }
 0x153   :  { %288 = vadd.xlane.f32.xlu0 %v287_v53  ;;  %v269_v55 = vsel %vm266_vm4, %v268_v52, %v264_v54  ;;  %v300_v63 = vmul.f32 %v449_v57, %v299_v59 }
 0x154   :  { %271 = vst [vmem:[#allocation10] sm:$0xff] %v269_v55 }
 0x155   :  { %319 = dma.vmem_to_hbm [thread:$0]  %s315_s4, 128, %s317_s25, [#allocation4]   ;;  %v301_v2 = vadd.f32 %v449_v57, %v300_v63 }
 0x157   :  { %v303_v5 = vsel %vm302_vm5, %v449_v57, %v301_v2 }
 0x1c6   :  { %v289_v60 = vpop.xlane.xlu0 %288 }
 0x1c7   :  { %v290_v61 = vrot.slane %v289_v60, 4 }
 0x1c9   :  { %v291_v62 = vadd.f32 %v290_v61, %v289_v60 }
 0x1cb   :  { %v292_v0 = vrot.slane %v291_v62, 2 }
 0x1cd   :  { %v293_v1 = vadd.f32 %v292_v0, %v291_v62 }
 0x1cf   :  { %v294_v3 = vrot.slane %v293_v1, 1 }
 0x1d1   :  { %v295_v4 = vadd.f32 %v294_v3, %v293_v1 }
 0x1d3   :  { %425 = vpush %v295_v4 }
 0x1d4   :  { %427 = vpush %v303_v5 }
 0x204   :  { %s426_s27 = spop %425 }
 0x205   :  { %s428_s8 = spop %427 }
 0x206   :  { %s305_s9 = smul.f32 %s428_s8, %s426_s27 }
 0x208   :  { %v306_v6 = vstv %s305_s9 }
 0x209   :  { %308 = vst.msk [vmem:[#allocation11] sm:$0x1] %vm307_vm6, %v306_v6 }
 0x20a   :  { %330 = dma.vmem_to_hbm [thread:$0]  %s326_s26, 16, %s328_s30, [#allocation12]  }
 0x20b   :  { %600 = dma.done.wait [#allocation4], 128  }
 0x20c   :  { %601 = vsyncadd [#allocation4], 4294967168 }
 0x20d   :  { %602 = dma.done.wait [#allocation12], 16  }
 0x20e   :  { %603 = vsyncadd [#allocation12], 4294967280 }
 0x20f   :  { %339 = vsyncpa [#allocation3], 1 }
 0x210   :  { %340 = vsyncpa [#allocation6], 1 }
 0x211   :  { %341 = vsyncpa [#allocation9], 1 }
 0x212   :  { %342 = vsyncpa [#allocation4], 1 }
 0x213   :  { %343 = vsyncpa [#allocation12], 1 }

</bundles_post_ra>
